<compile_context>
chip_gen: v5e
topology: v5e:2x2
jax: 0.10.0
libtpu: 0.0.40
codegen_flags: <defaults>
</compile_context>

<pallas_src>
import functools

import jax
import jax.numpy as jnp
from jax.experimental import pallas as pl
from jax.experimental.pallas import tpu as pltpu


def _round_up(x: int, m: int) -> int:
    return (x + m - 1) // m * m


def _pick_tile(padded: int, max_tile: int, align: int) -> int:
    """Largest multiple of `align` that divides `padded` and is <= max_tile."""
    t = min(max_tile, padded)
    t -= t % align
    t = max(t, align)
    while padded % t:
        t -= align
    return t


# -----------------------------------------------------------------------------
# Kernels
# -----------------------------------------------------------------------------
def _cond_linear_fused_kernel(x_ref, w_ref, b_ref, t_ref, e_ref, o_ref):
    # x: (tm, tk) f32, w: (tk, tn) bf16, b: (1, tn) f32, t: (tm, 1) i32,
    # e: (n_steps, tn) bf16, o: (tm, tn) f32  (o doubles as the accumulator).
    k = pl.program_id(2)

    @pl.when(k == 0)
    def _init():
        o_ref[...] = jnp.zeros_like(o_ref)

    # Cast x to bf16 in-register (x stays f32 in HBM -> half the MXU operand
    # traffic would otherwise be paid twice by a wrapper-side astype pass).
    o_ref[...] += jnp.dot(x_ref[...].astype(jnp.bfloat16), w_ref[...],
                          preferred_element_type=jnp.float32)

    @pl.when(k == pl.num_programs(2) - 1)
    def _epilogue():
        out = o_ref[...] + b_ref[...]                          # (tm, tn) + (1, tn)
        # Fused embedding gather: gamma[r, :] = embed[t[r], :] via a one-hot
        # bf16 matmul on the MXU (exact: one-hot is 0/1). No HBM gamma tensor.
        tm = o_ref.shape[0]
        n_steps = e_ref.shape[0]
        steps = jax.lax.broadcasted_iota(jnp.int32, (tm, n_steps), 1)
        onehot = (steps == t_ref[...]).astype(jnp.bfloat16)    # (tm, n_steps)
        gamma = jnp.dot(onehot, e_ref[...],
                        preferred_element_type=jnp.float32)    # (tm, tn) f32
        o_ref[...] = gamma * out


def _cond_linear_gamma_kernel(x_ref, w_ref, b_ref, g_ref, o_ref):
    # Variant for large n_steps: gamma = embed[t] is gathered outside (XLA take)
    # and arrives as a (tm, tn) bf16 tile, avoiding a (tm, n_steps) one-hot.
    k = pl.program_id(2)

    @pl.when(k == 0)
    def _init():
        o_ref[...] = jnp.zeros_like(o_ref)

    o_ref[...] += jnp.dot(x_ref[...].astype(jnp.bfloat16), w_ref[...],
                          preferred_element_type=jnp.float32)

    @pl.when(k == pl.num_programs(2) - 1)
    def _epilogue():
        o_ref[...] = g_ref[...].astype(jnp.float32) * (o_ref[...] + b_ref[...])


# -----------------------------------------------------------------------------
# One-time parameter preparation (reused weights: pay the cast/pad once, not
# once per forward call).
# -----------------------------------------------------------------------------
def prepare_cond_linear_params(w, b, embed, *, max_tk=512):
    """w: (num_out, num_in) f32 (PyTorch layout), b: (num_out,), embed: (n_steps, num_out).

    Returns (w_p, b_p, e_p, num_out): w_p (Kp, Np) bf16, b_p (1, Np) f32,
    e_p (n_steps, Np) bf16, with N padded to a lane multiple (lane-dense stores)
    and K left unpadded whenever a single K tile suffices.
    """
    num_out, num_in = w.shape
    Np = _round_up(num_out, 128)
    Kp = num_in if num_in <= max_tk else _round_up(num_in, 128)
    w_p = jnp.pad(w.T.astype(jnp.bfloat16), ((0, Kp - num_in), (0, Np - num_out)))
    b_p = jnp.pad(b.astype(jnp.float32), (0, Np - num_out)).reshape(1, Np)
    e_p = jnp.pad(embed.astype(jnp.bfloat16), ((0, 0), (0, Np - num_out)))
    return w_p, b_p, e_p, num_out


# -----------------------------------------------------------------------------
# Forward call
# -----------------------------------------------------------------------------
@functools.partial(
    jax.jit,
    static_argnames=("num_out", "tm", "tn", "tk", "fused_gather_max_steps"))
def conditional_linear(x, t, w_p, b_p, e_p, *, num_out,
                       tm=256, tn=256, tk=512, fused_gather_max_steps=256):
    """x: (B, num_in) f32, t: (B,) int. Returns (B, num_out) f32."""
    B, K = x.shape
    Kp, Np = w_p.shape
    n_steps = e_p.shape[0]

    # --- tile sizes (static) ------------------------------------------------
    # Full-dim blocks are legal regardless of (8,128) alignment, so small /
    # ragged B and K need no per-call zero padding.
    if B <= tm:
        Bp, tm_e = B, B
    else:
        tm_e = tm                       # multiple of 8
        Bp = _round_up(B, tm_e)
    tk_e = Kp if Kp <= tk else _pick_tile(Kp, tk, 128)
    tn_e = Np if Np <= tn else _pick_tile(Np, tn, 128)

    # --- per-call input prep (usually a no-op) ------------------------------
    t = t.astype(jnp.int32)
    if (Bp, Kp) != (B, K):
        x = jnp.pad(x, ((0, Bp - B), (0, Kp - K)))
    if Bp != B:
        t = jnp.pad(t, (0, Bp - B))
    t_col = t.reshape(Bp, 1)

    grid = (Bp // tm_e, Np // tn_e, Kp // tk_e)
    fused = n_steps <= fused_gather_max_steps

    flops = 2 * Bp * Kp * Np + (2 * Bp * n_steps * Np if fused else 0)
    bytes_accessed = (Bp * Kp * 4 + Kp * Np * 2 + Np * 4 + Bp * Np * 4
                      + (n_steps * Np * 2 + Bp * 4 if fused else Bp * Np * 2))

    common = dict(
        out_shape=jax.ShapeDtypeStruct((Bp, Np), jnp.float32),
        compiler_params=pltpu.CompilerParams(
            dimension_semantics=("parallel", "parallel", "arbitrary"),
            vmem_limit_bytes=32 * 1024 * 1024,   # safe for v7x's 64 MiB VMEM too
        ),
        cost_estimate=pl.CostEstimate(
            flops=flops, transcendentals=0, bytes_accessed=bytes_accessed),
    )

    x_spec = pl.BlockSpec((tm_e, tk_e), lambda i, j, k: (i, k))
    w_spec = pl.BlockSpec((tk_e, tn_e), lambda i, j, k: (k, j))
    b_spec = pl.BlockSpec((1, tn_e), lambda i, j, k: (0, j))
    o_spec = pl.BlockSpec((tm_e, tn_e), lambda i, j, k: (i, j))

    if fused:
        out_p = pl.pallas_call(
            _cond_linear_fused_kernel,
            grid_spec=pltpu.PrefetchScalarGridSpec(
                num_scalar_prefetch=0,
                grid=grid,
                in_specs=[
                    x_spec,
                    w_spec,
                    b_spec,
                    pl.BlockSpec((tm_e, 1), lambda i, j, k: (i, 0)),        # t column
                    pl.BlockSpec((n_steps, tn_e), lambda i, j, k: (0, j)),  # embed N-slice
                ],
                out_specs=o_spec,
            ),
            **common,
        )(x, w_p, b_p, t_col, e_p)
    else:
        # Large n_steps: (tm, n_steps) one-hot would blow vregs/FLOPs — gather
        # gamma with XLA instead and stream it as (tm, tn) bf16 tiles.
        gamma = jnp.take(e_p, jnp.clip(t, 0, n_steps - 1), axis=0)  # (Bp, Np) bf16
        out_p = pl.pallas_call(
            _cond_linear_gamma_kernel,
            grid_spec=pltpu.PrefetchScalarGridSpec(
                num_scalar_prefetch=0,
                grid=grid,
                in_specs=[x_spec, w_spec, b_spec, o_spec],
                out_specs=o_spec,
            ),
            **common,
        )(x, w_p, b_p, gamma)

    return out_p[:B, :num_out]


# -----------------------------------------------------------------------------
# Reference + tests
# -----------------------------------------------------------------------------
def reference(x, t, w, b, embed):
    return embed[t] * (x @ w.T + b[None, :])


def _run_case(key, B, num_in, num_out, n_steps):
    k_x, k_t, k_w, k_b, k_e = jax.random.split(key, 5)
    bound = 1.0 / (num_in ** 0.5)
    w = jax.random.uniform(k_w, (num_out, num_in), jnp.float32, -bound, bound)
    b = jax.random.uniform(k_b, (num_out,), jnp.float32, -bound, bound)
    embed = jax.random.uniform(k_e, (n_steps, num_out), jnp.float32, 0.0, 1.0)
    x = jax.random.normal(k_x, (B, num_in), jnp.float32)
    t = jax.random.randint(k_t, (B,), 0, n_steps, jnp.int32)

    params = prepare_cond_linear_params(w, b, embed)     # one-time prep
    w_p, b_p, e_p, n_out = params
    out = jax.block_until_ready(
        conditional_linear(x, t, w_p, b_p, e_p, num_out=n_out))
    ref = reference(x, t, w, b, embed)

    assert out.shape == (B, num_out)
    # bf16 matmul operands / bf16 gamma -> bf16-level tolerance vs f32 reference.
    assert jnp.allclose(out, ref, atol=3e-2, rtol=3e-2), "mismatch vs reference"


if __name__ == "__main__":
    key = jax.random.PRNGKey(0)
    k1, k2, k3 = jax.random.split(key, 3)

    # Hidden-layer-like shape: ConditionalLinear(32, 128, 50), fused gather path.
    _run_case(k1, B=16, num_in=32, num_out=128, n_steps=50)
    # First-layer / ragged shape: ConditionalLinear(2, 128, 50), non-aligned batch.
    _run_case(k2, B=10, num_in=2, num_out=128, n_steps=50)
    # Large n_steps (1000 diffusion steps): exercises the external-gather path.
    _run_case(k3, B=8, num_in=16, num_out=128, n_steps=1000)

    print("KERNEL_OK")
</pallas_src>

<mosaic_0001>
module attributes {stable_mosaic.version = 11 : i64} {
  func.func @_cond_linear_fused_kernel(%arg0: i32, %arg1: i32, %arg2: i32, %arg3: memref<16x32xf32, #tpu.memory_space<vmem>>, %arg4: memref<32x128xbf16, #tpu.memory_space<vmem>>, %arg5: memref<1x128xf32, #tpu.memory_space<vmem>>, %arg6: memref<16x1xi32, #tpu.memory_space<vmem>>, %arg7: memref<50x128xbf16, #tpu.memory_space<vmem>>, %arg8: memref<16x128xf32, #tpu.memory_space<vmem>>) attributes {dimension_semantics = [#tpu.dimension_semantics<parallel>, #tpu.dimension_semantics<parallel>, #tpu.dimension_semantics<arbitrary>], iteration_bounds = array<i64: 1, 1, 1>, scalar_prefetch = 0 : i64, scratch_operands = 0 : i64, tpu.core_type = #tpu.core_type<tc>, window_params = [{transform_indices = @transform_0, window_bounds = array<i64: 16, 32>}, {transform_indices = @transform_1, window_bounds = array<i64: 32, 128>}, {transform_indices = @transform_2, window_bounds = array<i64: 1, 128>}, {transform_indices = @transform_3, window_bounds = array<i64: 16, 1>}, {transform_indices = @transform_4, window_bounds = array<i64: 50, 128>}, {transform_indices = @transform_5, window_bounds = array<i64: 16, 128>}]} {
    %c0_i32 = arith.constant 0 : i32
    %0 = arith.cmpi eq, %arg2, %c0_i32 : i32
    %1 = arith.extui %0 : i1 to i32
    %c0_i32_0 = arith.constant 0 : i32
    %2 = arith.cmpi ne, %1, %c0_i32_0 : i32
    scf.if %2 {
      %cst_10 = arith.constant 0.000000e+00 : f32
      %13 = vector.broadcast %cst_10 : f32 to vector<16x128xf32>
      %c0_11 = arith.constant 0 : index
      %c0_12 = arith.constant 0 : index
      %14 = vector.load %arg8[%c0_11, %c0_12] : memref<16x128xf32, #tpu.memory_space<vmem>>, vector<16x128xf32>
      tpu.vector_store %arg8[%c0_11, %c0_12], %13 {strides = array<i32>} : memref<16x128xf32, #tpu.memory_space<vmem>>, vector<16x128xf32>,
    } else {
    }
    %c0 = arith.constant 0 : index
    %c0_1 = arith.constant 0 : index
    %3 = vector.load %arg8[%c0, %c0_1] : memref<16x128xf32, #tpu.memory_space<vmem>>, vector<16x128xf32>
    %c0_2 = arith.constant 0 : index
    %c0_3 = arith.constant 0 : index
    %4 = vector.load %arg3[%c0_2, %c0_3] : memref<16x32xf32, #tpu.memory_space<vmem>>, vector<16x32xf32>
    %5 = arith.truncf %4 : vector<16x32xf32> to vector<16x32xbf16>
    %c0_4 = arith.constant 0 : index
    %c0_5 = arith.constant 0 : index
    %6 = vector.load %arg4[%c0_4, %c0_5] : memref<32x128xbf16, #tpu.memory_space<vmem>>, vector<32x128xbf16>
    %cst = arith.constant dense<0.000000e+00> : vector<16x128xf32>
    %7 = tpu.matmul %5, %6, %cst {dimension_numbers = #tpu.dot_dimension_numbers<[1], [0], [0], [1], [0, 0, 1, 1], [], []>} : vector<16x32xbf16>, vector<32x128xbf16>, vector<16x128xf32> -> vector<16x128xf32>
    %8 = arith.addf %3, %7 : vector<16x128xf32>
    %c0_6 = arith.constant 0 : index
    %c0_7 = arith.constant 0 : index
    %9 = vector.load %arg8[%c0_6, %c0_7] : memref<16x128xf32, #tpu.memory_space<vmem>>, vector<16x128xf32>
    tpu.vector_store %arg8[%c0_6, %c0_7], %8 {strides = array<i32>} : memref<16x128xf32, #tpu.memory_space<vmem>>, vector<16x128xf32>,
    %c0_i32_8 = arith.constant 0 : i32
    %10 = arith.cmpi eq, %arg2, %c0_i32_8 : i32
    %11 = arith.extui %10 : i1 to i32
    %c0_i32_9 = arith.constant 0 : i32
    %12 = arith.cmpi ne, %11, %c0_i32_9 : i32
    scf.if %12 {
      %c0_10 = arith.constant 0 : index
      %c0_11 = arith.constant 0 : index
      %13 = vector.load %arg8[%c0_10, %c0_11] : memref<16x128xf32, #tpu.memory_space<vmem>>, vector<16x128xf32>
      %c0_12 = arith.constant 0 : index
      %c0_13 = arith.constant 0 : index
      %14 = vector.load %arg5[%c0_12, %c0_13] : memref<1x128xf32, #tpu.memory_space<vmem>>, vector<1x128xf32>
      %15 = vector.broadcast %14 : vector<1x128xf32> to vector<16x128xf32>
      %16 = arith.addf %13, %15 : vector<16x128xf32>
      %17 = tpu.iota {dimensions = array<i32: 1>} : vector<16x50xi32>
      %c0_14 = arith.constant 0 : index
      %c0_15 = arith.constant 0 : index
      %18 = vector.load %arg6[%c0_14, %c0_15] : memref<16x1xi32, #tpu.memory_space<vmem>>, vector<16x1xi32>
      %19 = vector.broadcast %18 : vector<16x1xi32> to vector<16x50xi32>
      %20 = arith.cmpi eq, %17, %19 : vector<16x50xi32>
      %21 = arith.extui %20 : vector<16x50xi1> to vector<16x50xi32>
      %22 = arith.sitofp %21 : vector<16x50xi32> to vector<16x50xf32>
      %23 = arith.truncf %22 : vector<16x50xf32> to vector<16x50xbf16>
      %c0_16 = arith.constant 0 : index
      %c0_17 = arith.constant 0 : index
      %24 = vector.load %arg7[%c0_16, %c0_17] : memref<50x128xbf16, #tpu.memory_space<vmem>>, vector<50x128xbf16>
      %cst_18 = arith.constant dense<0.000000e+00> : vector<16x128xf32>
      %25 = tpu.matmul %23, %24, %cst_18 {dimension_numbers = #tpu.dot_dimension_numbers<[1], [0], [0], [1], [0, 0, 1, 1], [], []>} : vector<16x50xbf16>, vector<50x128xbf16>, vector<16x128xf32> -> vector<16x128xf32>
      %26 = arith.mulf %25, %16 : vector<16x128xf32>
      %c0_19 = arith.constant 0 : index
      %c0_20 = arith.constant 0 : index
      %27 = vector.load %arg8[%c0_19, %c0_20] : memref<16x128xf32, #tpu.memory_space<vmem>>, vector<16x128xf32>
      tpu.vector_store %arg8[%c0_19, %c0_20], %26 {strides = array<i32>} : memref<16x128xf32, #tpu.memory_space<vmem>>, vector<16x128xf32>,
    } else {
    }
    return
  }
  func.func @transform_0(%arg0: i32, %arg1: i32, %arg2: i32) -> (i32, i32) {
    %c0_i32 = arith.constant 0 : i32
    return %arg0, %arg2 : i32, i32
  }
  func.func @transform_1(%arg0: i32, %arg1: i32, %arg2: i32) -> (i32, i32) {
    %c0_i32 = arith.constant 0 : i32
    return %arg2, %arg1 : i32, i32
  }
  func.func @transform_2(%arg0: i32, %arg1: i32, %arg2: i32) -> (i32, i32) {
    %c0_i32 = arith.constant 0 : i32
    %c0_i32_0 = arith.constant 0 : i32
    return %c0_i32, %arg1 : i32, i32
  }
  func.func @transform_3(%arg0: i32, %arg1: i32, %arg2: i32) -> (i32, i32) {
    %c0_i32 = arith.constant 0 : i32
    %c0_i32_0 = arith.constant 0 : i32
    return %arg0, %c0_i32 : i32, i32
  }
  func.func @transform_4(%arg0: i32, %arg1: i32, %arg2: i32) -> (i32, i32) {
    %c0_i32 = arith.constant 0 : i32
    %c0_i32_0 = arith.constant 0 : i32
    return %c0_i32, %arg1 : i32, i32
  }
  func.func @transform_5(%arg0: i32, %arg1: i32, %arg2: i32) -> (i32, i32) {
    %c0_i32 = arith.constant 0 : i32
    return %arg0, %arg1 : i32, i32
  }
}

</mosaic_0001>

<bundles_post_ra>
// kernel: conditional_linear.1
= control target key start
LH: loop header
LB: loop body
LE: loop exit
PB: predicated region body
PF: predicated region fallthrough
CT: control target
= control target key end

     0   :  { %10 = vsyncpa [#allocation3], 0  ;;  %s386_s0 = inlined_call_operand.vmem [shape: f32[16,32], index: 0, kind: input, shape index: {}]   ;;  %s387_s1 = inlined_call_operand.hbm [shape: bf16[32,128], index: 1, kind: input, shape index: {}]   ;;  %s388_s2 = inlined_call_operand.vmem [shape: f32[1,128], index: 2, kind: input, shape index: {}]   ;;  %s389_s3 = inlined_call_operand.vmem [shape: s32[16,1], index: 3, kind: input, shape index: {}]   ;;  %s390_s4 = inlined_call_operand.hbm [shape: bf16[50,128], index: 4, kind: input, shape index: {}]   ;;  %s391_s5 = inlined_call_operand.hbm [shape: f32[16,128], index: 5, kind: output, shape index: {}]  }
   0x1   :  { %11 = vsyncpa [#allocation6], 0 }
   0x2   :  { %12 = vsyncpa [#allocation4], 0  ;;  %s19_s20 = sshll.u32 %s387_s1, 4  ;;  %s323_s21 = smov [#allocation2]   ;;  %s20_s20 = int_to_ptr.hbm [resolvable:$true] %s19_s20 }
   0x3   :  { %s21_s22 = sshll.u32 %s323_s21, 4  ;;  %s36_s25 = sshll.u32 %s390_s4, 4  ;;  %s22_s22 = int_to_ptr.vmem [resolvable:$true] %s21_s22  ;;  %s37_s25 = int_to_ptr.hbm [resolvable:$true] %s36_s25 }
   0x4   :  { %s324_s26 = smov 64   ;;  %s325_s27 = smov 4  }
   0x5   :  { %27 = dma.hbm_to_vmem [thread:$0]  %s20_s20, 256, %s22_s22, [#allocation3], %s324_s26, %s324_s26, %s325_s27  }
   0x6   :  { %s326_s28 = smov [#allocation5]  }
   0x7   :  { %s38_s29 = sshll.u32 %s326_s28, 4  ;;  %s39_s29 = int_to_ptr.vmem [resolvable:$true] %s38_s29 }
   0x8   :  { %44 = dma.hbm_to_vmem [thread:$0]  %s37_s25, 448, %s39_s29, [#allocation6], %s324_s26, %s324_s26, %s325_s27  }
   0x9   :  { %317 = dma.done.wait [#allocation3], 256  }
   0xa   :  { %318 = vsyncadd [#allocation3], 4294967040 }
   0xb   :  { %319 = dma.done.wait [#allocation6], 448  }
   0xc   :  { %320 = vsyncadd [#allocation6], 4294966848  ;;  %v327_v0 = vmov 0   ;;  %v116_v1 = vld [vmem:[%s389_s3] sm:$0xff]  ;;  %v230_v2 = vld [vmem:[#allocation2 + $0x8] sm:$0xff]  ;;  %vm163_vm0 = vcmask 1040384   ;;  %v114_v15 = vlaneseq }
   0xd   :  { %243 = vset.pattern.permute.xlu0 %v327_v0  ;;  %v229_v3 = vld [vmem:[#allocation2] sm:$0xff]  ;;  %91 = vmatpush.bf16.msra.mxu0 %v230_v2  ;;  %v63_v5 = vld [vmem:[%s386_s0 + $0x8] sm:$0xff]  ;;  %vm81_vm1 = vcmask 261120   ;;  %v232_v13 = vld [vmem:[#allocation5 + $0x8] sm:$0xff]  ;;  %v328_v19 = vmov 0.0   ;;  %vm159_vm4 = vcmask 408576  }
   0xe   :  { %119 = vperm.xlu0 %243, %v116_v1   ;;  %v62_v4 = vld [vmem:[%s386_s0] sm:$0xff]  ;;  %v137_v6 = vld [vmem:[#allocation5 + $0x18] sm:$0x1]  ;;  %v231_v14 = vld [vmem:[#allocation5] sm:$0xff]  ;;  %v115_v17 = vand.u32 127, %v114_v15  ;;  %s329_s11 = smov [#allocation7]  }
   0xf   :  { %v151_v7 = vunpack.c.l.b16 %v137_v6  ;;  %v64_v8 = vpack.c.bf16 %v63_v5, %v62_v4  ;;  %v117_v10 = vld [vmem:[%s389_s3 + $0x8] sm:$0xff]  ;;  %v233_v12 = vld [vmem:[#allocation5 + $0x10] sm:$0xff]  ;;  %s189_s12 = sshll.u32 %s329_s11, 4  ;;  %s191_s15 = sshll.u32 %s391_s5, 4  ;;  %s190_s12 = int_to_ptr.vmem [resolvable:$true] %s189_s12  ;;  %s192_s15 = int_to_ptr.hbm [resolvable:$true] %s191_s15 }
  0x10   :  { %v244_v24 = vld [vmem:[%s388_s2] ss:$0 sm:$0xff]  ;;  %s330_s16 = smov 128   ;;  %s331_s17 = smov 8  }
  0x11   :  { %v155_v9 = vpack.c.b16 %v151_v7, %v151_v7  ;;  %92 = vmatpush.bf16.msra.mxu0 %v229_v3 }
  0x13   :  { %v165_v11 = vsel %vm163_vm0, %v155_v9, 0 }
  0x14   :  { %171 = vmatpush.bf16.msra.mxu1 %v165_v11  ;;  %213 = vmatmul.msk.bf16.vlgmr.msra.gmra.mxu0 %vm81_vm1, %v64_v8 }
  0x16   :  { %122 = vperm.xlu0 %243, %v117_v10  }
  0x18   :  { %172 = vmatpush.bf16.msra.mxu1 %v233_v12 }
  0x1c   :  { %173 = vmatpush.bf16.msra.mxu1 %v232_v13 }
  0x20   :  { %174 = vmatpush.bf16.msra.mxu1 %v231_v14 }
  0x80   :  { %v120_v16 = vpop.permute.xlu0 %119 }
  0x81   :  { %vm124_vm2 = vcmp.eq.s32.totalorder %v115_v17, %v120_v16 }
  0x82   :  { %v214_v20 = vsel %vm124_vm2, 1.0, %v328_v19 }
  0x88   :  { %v123_v18 = vpop.permute.xlu0 %122 }
  0x89   :  { %vm125_vm3 = vcmp.eq.s32.totalorder %v115_v17, %v123_v18 }
  0x8a   :  { %v215_v21 = vsel %vm125_vm3, 1.0, %v328_v19 }
  0x8b   :  { %v130_v22 = vpack.c.bf16 %v215_v21, %v214_v20 }
  0x8d   :  { %228 = vmatmul.msk.bf16.vlgmr.msra.gmra.mxu1 %vm159_vm4, %v130_v22 }
  0x91   :  { %v94_v23 = vpop.f32.mrf.mxu0 }
  0x92   :  { %v112_v25 = vadd.f32 %v244_v24, %v94_v23 }
  0x99   :  { %v96_v26 = vpop.f32.mrf.mxu0 }
  0x9a   :  { %v113_v29 = vadd.f32 %v244_v24, %v96_v26 }
 0x10a   :  { %v176_v27 = vpop.f32.mrf.mxu1 }
 0x10b   :  { %v181_v28 = vmul.f32 %v176_v27, %v112_v25 }
 0x10d   :  { %183 = vst [vmem:[#allocation7] sm:$0xff] %v181_v28 }
 0x112   :  { %v178_v30 = vpop.f32.mrf.mxu1 }
 0x113   :  { %v182_v31 = vmul.f32 %v178_v30, %v113_v29 }
 0x115   :  { %184 = vst [vmem:[#allocation7 + $0x8] sm:$0xff] %v182_v31 }
 0x116   :  { %197 = dma.vmem_to_hbm [thread:$0]  %s190_s12, 256, %s192_s15, [#allocation4], %s330_s16, %s330_s16, %s331_s17  }
 0x117   :  { %321 = dma.done.wait [#allocation4], 256  }
 0x118   :  { %322 = vsyncadd [#allocation4], 4294967040 }
 0x119   :  { %202 = vsyncpa [#allocation3], 1 }
 0x11a   :  { %203 = vsyncpa [#allocation6], 1 }
 0x11b   :  { %204 = vsyncpa [#allocation4], 1 }

</bundles_post_ra>
